<compile_context>
chip_gen: v7x
topology: tpu7x:2x2x1
jax: 0.10.0
libtpu: 0.0.40
codegen_flags: <defaults>
</compile_context>

<pallas_src>
import jax
import jax.numpy as jnp
from jax.experimental import pallas as pl
from jax.experimental.pallas import tpu as pltpu


def _attention_kernel(enc_ref, we_ref, out_ref):
    """One batch tile: logits -> softmax over S -> attention-weighted context.

    enc_ref : (Bt, S, H)  encoder outputs, native dtype (bf16/f32)
    we_ref  : (1, H)      folded projection weights, f32
    out_ref : (Bt, H)     context output
    """
    enc = enc_ref[...]                       # keep native dtype (no blanket f32 cast)
    we = we_ref[...]                         # (1, H), f32

    # logits[b, s] = enc[b, s, :] . Weff_e   (VPU multiply + lane reduction,
    # accumulated in f32 via promotion with the f32 weights).  The hidden-state
    # term of the original module is constant per row and cancels in softmax.
    logits = jnp.sum(enc * we, axis=-1)      # (Bt, S), f32

    # Softmax over the sequence axis (dim=1 in the PyTorch code); f32 math.
    m = jnp.max(logits, axis=-1, keepdims=True)
    p = jnp.exp(logits - m)                  # EUP
    s = jnp.sum(p, axis=-1, keepdims=True)
    inv = pl.reciprocal(s, approx=True)      # EUP slot (otherwise idle)
    inv = inv * (2.0 - s * inv)              # one Newton step -> ~f32 accuracy
    attn = (p * inv).astype(enc.dtype)       # (Bt, S)

    # context[b, :] = sum_s attn[b, s] * enc[b, s, :]
    # Batched matvec on the MXU (f32 accumulation) instead of a VPU
    # broadcast-multiply-sum: avoids a (Bt, S, H) f32 temp and keeps the
    # kernel HBM-bound on v5e/v6e/v7x.
    ctx = jnp.einsum("bqs,bsh->bqh", attn[:, None, :], enc,
                     preferred_element_type=jnp.float32)       # (Bt, 1, H)
    out_ref[...] = jnp.squeeze(ctx, axis=1).astype(out_ref.dtype)  # lane-dense store


def _fold_params(params, hidden_size):
    """Fold the activation-free linear1..linear4 + to_weight chain (in f32).

    Only the encoder half of the folded weight affects the output: the
    hidden-state half and all biases add a per-row constant to the logits,
    which the softmax removes.  Returns Weff_e with shape (1, H), f32."""
    H = hidden_size
    w1, _b1, w2, _b2, w3, _b3, w4, _b4, wv = params
    weff = (w1.astype(jnp.float32) @ w2.astype(jnp.float32)
            @ w3.astype(jnp.float32) @ w4.astype(jnp.float32)
            @ wv.astype(jnp.float32))                          # (2H, 1)
    return weff[:H].reshape(1, H)


def _default_bt(B, S, H, itemsize):
    """Batch-tile that (a) divides B, (b) satisfies the (8,128) block rule on
    the (bt, H) output tile (bt multiple of 8, or bt == B), and (c) keeps the
    encoder tile around ~2 MiB so the double-buffered pipeline overlaps DMA
    with compute and fits comfortably in scoped VMEM on v5e/v6e/v7x."""
    target_rows = max(1, (2 << 20) // max(1, S * H * itemsize))
    best = None
    d = 8
    while d <= min(B, target_rows):
        if B % d == 0:
            best = d
        d += 8
    if best is None:
        return B                      # tiny batch: single full-batch step
    if best == B and B >= 16 and (B // 2) % 8 == 0:
        best = B // 2                 # >= 2 grid steps so "parallel" can shard
    return best                       #   the batch axis across v7x's 2 TCs


def attention_forward(hidden_state, encoder_outputs, params, *, bt=None):
    """hidden_state: (B, H) (== hidden_state[0][0] in the PyTorch forward);
    encoder_outputs: (B, S, H)  ->  context (B, H).

    The context is mathematically independent of hidden_state (its logit
    contribution is a per-row constant under softmax), so the kernel does not
    read it; the argument is kept only for API parity with the module."""
    del hidden_state
    B, S, H = encoder_outputs.shape
    itemsize = jnp.dtype(encoder_outputs.dtype).itemsize

    we = _fold_params(params, H)      # tiny f32 weight-only precompute

    if bt is None:
        bt = _default_bt(B, S, H, itemsize)
    assert B % bt == 0, "bt must divide B"
    assert bt % 8 == 0 or bt == B, "bt must be a multiple of 8 (or the full batch)"
    n_steps = B // bt

    # Explicit VMEM budget only when a (user-chosen) tile outgrows the default
    # scoped limit; capped so it stays within v7x's 64 MiB physical VMEM.
    enc_tile_bytes = bt * S * H * itemsize
    est = 2 * enc_tile_bytes + 2 * bt * H * 4 + 4 * bt * S * 4 + (2 << 20)
    vmem_limit = min(est + (8 << 20), 64 << 20) if est > (24 << 20) else None

    # NOTE: for very long S where even a small-bt (bt, S, H) tile exceeds the
    # VMEM budget, the extension is an "arbitrary" S grid axis with an online
    # softmax (m/l/ctx scratch accumulators + pl.when init/finalize).

    grid_spec = pltpu.PrefetchScalarGridSpec(
        num_scalar_prefetch=0,
        grid=(n_steps,),
        in_specs=[
            pl.BlockSpec((bt, S, H), lambda i: (i, 0, 0)),   # encoder tile (streamed)
            pl.BlockSpec((1, H), lambda i: (0, 0)),          # folded weights (resident)
        ],
        out_specs=pl.BlockSpec((bt, H), lambda i: (i, 0)),   # lane-dense (bt, H) block
    )

    return pl.pallas_call(
        _attention_kernel,
        out_shape=jax.ShapeDtypeStruct((B, H), encoder_outputs.dtype),
        grid_spec=grid_spec,
        compiler_params=pltpu.CompilerParams(
            dimension_semantics=("parallel",),
            vmem_limit_bytes=vmem_limit),
    )(encoder_outputs, we)


def _reference(hidden_state, encoder_outputs, params):
    """Pure-JAX transcription of the PyTorch forward, for correctness check."""
    B, S, H = encoder_outputs.shape
    w1, b1, w2, b2, w3, b3, w4, b4, wv = params
    hid = jnp.repeat(hidden_state[:, None, :], S, axis=1)
    mi = jnp.concatenate([encoder_outputs, hid], axis=2).reshape(-1, 2 * H)
    x = mi @ w1 + b1
    x = x @ w2 + b2
    x = x @ w3 + b3
    x = x @ w4 + b4
    aw = (x @ wv).reshape(B, S)
    aw = jax.nn.softmax(aw, axis=1)
    return jnp.einsum("bs,bsh->bh", aw, encoder_outputs)


def _init_params(key, hidden_size):
    """Deterministic PyTorch-style init: U(-1/sqrt(fan_in), 1/sqrt(fan_in)).
    Weights stored transposed as (in_features, out_features)."""
    ks = jax.random.split(key, 9)

    def unif(k, shape, fan_in):
        bound = 1.0 / jnp.sqrt(jnp.float32(fan_in))
        return jax.random.uniform(k, shape, jnp.float32, -bound, bound)

    H = hidden_size
    w1 = unif(ks[0], (2 * H, H), 2 * H)
    b1 = unif(ks[1], (H,), 2 * H)
    w2 = unif(ks[2], (H, H), H)
    b2 = unif(ks[3], (H,), H)
    w3 = unif(ks[4], (H, H), H)
    b3 = unif(ks[5], (H,), H)
    w4 = unif(ks[6], (H, H), H)
    b4 = unif(ks[7], (H,), H)
    wv = unif(ks[8], (H, 1), H)   # to_weight, bias=False
    return (w1, b1, w2, b2, w3, b3, w4, b4, wv)


if __name__ == "__main__":
    B, S, H = 2, 8, 32
    key = jax.random.PRNGKey(0)
    k_param, k_enc, k_hid = jax.random.split(key, 3)

    params = _init_params(k_param, H)
    encoder_outputs = jax.random.normal(k_enc, (B, S, H), jnp.float32)
    # corresponds to PyTorch hidden_state[0][0] (first-layer hidden vector)
    hidden_state = jax.random.normal(k_hid, (B, H), jnp.float32)

    ctx = attention_forward(hidden_state, encoder_outputs, params)
    ctx = jax.block_until_ready(ctx)

    ref = _reference(hidden_state, encoder_outputs, params)
    assert ctx.shape == (B, H)
    # Folding the linear chain reorders FP ops; differences are ~1e-6.
    assert jnp.allclose(ctx, ref, rtol=1e-4, atol=1e-5), "mismatch vs reference"
    print("KERNEL_OK")
</pallas_src>

<mosaic_0001>
module attributes {stable_mosaic.version = 11 : i64} {
  func.func @_attention_kernel(%arg0: i32, %arg1: memref<2x8x32xf32, #tpu.memory_space<vmem>>, %arg2: memref<1x32xf32, #tpu.memory_space<vmem>>, %arg3: memref<2x32xf32, #tpu.memory_space<vmem>>) attributes {dimension_semantics = [#tpu.dimension_semantics<parallel>], iteration_bounds = array<i64: 1>, scalar_prefetch = 0 : i64, scratch_operands = 0 : i64, tpu.core_type = #tpu.core_type<tc>, window_params = [{transform_indices = @transform_0, window_bounds = array<i64: 2, 8, 32>}, {pipeline_mode = #tpu.pipeline_mode<synchronous>, transform_indices = @transform_1, window_bounds = array<i64: 1, 32>}, {transform_indices = @transform_2, window_bounds = array<i64: 2, 32>}]} {
    %c0 = arith.constant 0 : index
    %c0_0 = arith.constant 0 : index
    %c0_1 = arith.constant 0 : index
    %0 = vector.load %arg1[%c0, %c0_0, %c0_1] : memref<2x8x32xf32, #tpu.memory_space<vmem>>, vector<2x8x32xf32>
    %c0_2 = arith.constant 0 : index
    %c0_3 = arith.constant 0 : index
    %1 = vector.load %arg2[%c0_2, %c0_3] : memref<1x32xf32, #tpu.memory_space<vmem>>, vector<1x32xf32>
    %2 = vector.shape_cast %1 : vector<1x32xf32> to vector<1x1x32xf32>
    %3 = vector.broadcast %2 : vector<1x1x32xf32> to vector<2x8x32xf32>
    %4 = arith.mulf %0, %3 : vector<2x8x32xf32>
    %cst = arith.constant dense<0.000000e+00> : vector<2x8xf32>
    %5 = vector.multi_reduction <add>, %4, %cst [2] : vector<2x8x32xf32> to vector<2x8xf32>
    %cst_4 = arith.constant dense<0xFF800000> : vector<2xf32>
    %6 = vector.multi_reduction <maximumf>, %5, %cst_4 [1] : vector<2x8xf32> to vector<2xf32>
    %7 = vector.shape_cast %6 : vector<2xf32> to vector<2x1xf32>
    %8 = vector.broadcast %7 : vector<2x1xf32> to vector<2x8xf32>
    %9 = arith.subf %5, %8 : vector<2x8xf32>
    %10 = math.exp %9 : vector<2x8xf32>
    %cst_5 = arith.constant dense<0.000000e+00> : vector<2xf32>
    %11 = vector.multi_reduction <add>, %10, %cst_5 [1] : vector<2x8xf32> to vector<2xf32>
    %12 = vector.shape_cast %11 : vector<2xf32> to vector<2x1xf32>
    %13 = tpu.reciprocal %12 {approx = true} : vector<2x1xf32> -> vector<2x1xf32>
    %14 = arith.mulf %12, %13 : vector<2x1xf32>
    %cst_6 = arith.constant 2.000000e+00 : f32
    %15 = vector.broadcast %cst_6 : f32 to vector<2x1xf32>
    %16 = arith.subf %15, %14 : vector<2x1xf32>
    %17 = arith.mulf %13, %16 : vector<2x1xf32>
    %18 = vector.broadcast %17 : vector<2x1xf32> to vector<2x8xf32>
    %19 = arith.mulf %10, %18 : vector<2x8xf32>
    %20 = vector.shape_cast %19 : vector<2x8xf32> to vector<2x1x8xf32>
    "tpu.trace_start"() <{level = 10 : i32, message = "bqs,bsh->bqh"}> : () -> ()
    %cst_7 = arith.constant dense<0.000000e+00> : vector<2x1x32xf32>
    %21 = tpu.matmul %20, %0, %cst_7 {dimension_numbers = #tpu.dot_dimension_numbers<[2], [1], [1], [2], [0, 0, 0, 1, 1, 2], [0], [0]>} : vector<2x1x8xf32>, vector<2x8x32xf32>, vector<2x1x32xf32> -> vector<2x1x32xf32>
    "tpu.trace_stop"() : () -> ()
    %22 = vector.shape_cast %21 : vector<2x1x32xf32> to vector<2x32xf32>
    %c0_8 = arith.constant 0 : index
    %c0_9 = arith.constant 0 : index
    %23 = vector.load %arg3[%c0_8, %c0_9] : memref<2x32xf32, #tpu.memory_space<vmem>>, vector<2x32xf32>
    tpu.vector_store %arg3[%c0_8, %c0_9], %22 {strides = array<i32>} : memref<2x32xf32, #tpu.memory_space<vmem>>, vector<2x32xf32>,
    return
  }
  func.func @transform_0(%arg0: i32) -> (i32, i32, i32) {
    %c0_i32 = arith.constant 0 : i32
    %c0_i32_0 = arith.constant 0 : i32
    %c0_i32_1 = arith.constant 0 : i32
    return %arg0, %c0_i32, %c0_i32_0 : i32, i32, i32
  }
  func.func @transform_1(%arg0: i32) -> (i32, i32) {
    %c0_i32 = arith.constant 0 : i32
    %c0_i32_0 = arith.constant 0 : i32
    %c0_i32_1 = arith.constant 0 : i32
    return %c0_i32, %c0_i32_0 : i32, i32
  }
  func.func @transform_2(%arg0: i32) -> (i32, i32) {
    %c0_i32 = arith.constant 0 : i32
    %c0_i32_0 = arith.constant 0 : i32
    return %arg0, %c0_i32 : i32, i32
  }
}

</mosaic_0001>

<bundles_post_ra>
// kernel: tpu_custom_call.1
= control target key start
LH: loop header
LB: loop body
LE: loop exit
PB: predicated region body
PF: predicated region fallthrough
CT: control target
= control target key end

     0   :  { %7 = vsyncpa [#allocation3], 0  ;;  %s439_s0 = inlined_call_operand.hbm [shape: f32[2,8,32], index: 0, kind: input, shape index: {}]   ;;  %s440_s1 = inlined_call_operand.vmem [shape: f32[1,32], index: 1, kind: input, shape index: {}]   ;;  %s441_s2 = inlined_call_operand.hbm [shape: f32[2,32], index: 2, kind: output, shape index: {}]  }
   0x1   :  { %8 = vsyncpa [#allocation4], 0  ;;  %s381_s9 = smov [#allocation2]   ;;  %s333_s13 = scalar_lea.hbm %s439_s0, 256 }
   0x2   :  { %s14_s10 = sshll.u32 %s381_s9, 4  ;;  %p334_p0 = scmp.ne.s32.totalorder %s439_s0, %s333_s13  ;;  %s15_s10 = int_to_ptr.vmem [resolvable:$true] %s14_s10 }
   0x3   :  { %p337_p1 = scmp.lt.u32.totalorder %s333_s13, %s439_s0 }
   0x5   :  { %p339_p2 = pnand %p337_p1, %p334_p0 }
   0x7   :  { %342 = shalt.err (!%p339_p2)
}
   0x8   :  { %s343_s18 = scalar_lea.vmem %s15_s10, 256  ;;  %p348_p4 = scmp.lt.s32.totalorder %s15_s10, %s15_s10 }
   0x9   :  { %p344_p3 = scmp.ne.s32.totalorder %s15_s10, %s343_s18  ;;  %p349_p5 = scmp.lt.s32.totalorder %s343_s18, %s343_s18 }
   0xb   :  { %p350_p6 = por %p349_p5, %p348_p4 }
   0xd   :  { %p351_p7 = pnand %p350_p6, %p344_p3 }
   0xf   :  { %354 = shalt.err (!%p351_p7)
}
  0x10   :  { %s382_s19 = smov 128   ;;  %s383_s20 = smov 8  }
  0x11   :  { %20 = dma.hbm_to_vmem [thread:$0]  %s439_s0, 256, %s15_s10, [#allocation3], %s382_s19, %s382_s19, %s383_s20  }
  0x12   :  { %377 = dma.done.wait [#allocation3], 256  }
  0x13   :  { %378 = vsyncadd [#allocation3], 4294967040  ;;  %v415_v0 = vld [vmem:[#allocation2] sm:$0xff]  ;;  %vm37_vm0 = vcmask 261120   ;;  %v27_v2 = vld [vmem:[#allocation2 + $0x8] sm:$0xff]  ;;  %v46_v7 = vlaneseq  ;;  %vm56_vm1 = vcmask 1041409  }
  0x14   :  { %v301_v1 = vld [vmem:[%s440_s1] ss:$0 sm:$0xff]  ;;  %vm59_vm2 = vcmask 58368   ;;  %v384_v17 = vmov 0   ;;  %v385_v43 = vmov 0.0   ;;  %vm386_vm3 = vmmov 0  }
  0x15   :  { %v35_v3 = vmul.f32 %v301_v1, %v415_v0  ;;  %v36_v4 = vmul.f32 %v301_v1, %v27_v2  ;;  %v47_v8 = vand.u32 127, %v46_v7  ;;  %v49_v9 = vshrl.u32 %v46_v7, 7  ;;  %326 = vset.pattern.permute.xlu0 %v384_v17  ;;  %325 = vset.pattern.permute.xlu1 %v384_v17  ;;  %s387_s0 = smov [#allocation5]  }
  0x16   :  { %313 = vmatprep.subr.mxu1 %v385_v43  ;;  %315 = vmatprep.mubr.msk.f32.mxu1 %vm386_vm3, %v385_v43  ;;  %vm126_vm4 = vcmask 64512   ;;  %s292_s1 = sshll.u32 %s387_s0, 4  ;;  %vm284_vm5 = vcmask 254976   ;;  %s293_s1 = int_to_ptr.vmem [resolvable:$true] %s292_s1 }
  0x17   :  { %v38_v5 = vsel %vm37_vm0, %v35_v3, 0.0  ;;  %v41_v6 = vsel %vm37_vm0, %v36_v4, 0.0  ;;  %v50_v11 = vsub.s32 %v47_v8, %v49_v9  ;;  %v66_v18 = vsub.s32 0, %v49_v9  ;;  %314 = vmatpush3.msra.mxu1 %v27_v2  ;;  %308 = vmatprep.subr.mxu0 %v385_v43  ;;  %s355_s25 = scalar_lea.vmem %s293_s1, 32  ;;  %p360_p9 = scmp.lt.s32.totalorder %s293_s1, %s293_s1 }
  0x18   :  { %39 = vadd.xlane.f32.xlu0 %v38_v5  ;;  %v70_v19 = vsub.s32 1, %v49_v9  ;;  %310 = vmatprep.mubr.msk.f32.mxu0 %vm386_vm3, %v385_v43  ;;  %p356_p8 = scmp.ne.s32.totalorder %s293_s1, %s355_s25  ;;  %p361_p10 = scmp.lt.s32.totalorder %s355_s25, %s355_s25 }
  0x19   :  { %309 = vmatpush3.msra.mxu0 %v415_v0 }
  0x1a   :  { %p362_p11 = por %p361_p10, %p360_p9 }
  0x1c   :  { %42 = vadd.xlane.f32.xlu0 %v41_v6  ;;  %p363_p12 = pnand %p362_p11, %p356_p8 }
  0xa5   :  { %v40_v10 = vpop.xlane.xlu0 %39 }
  0xa6   :  { %v51_v13 = vrot.slane %v40_v10, %v50_v11 }
  0xa9   :  { %v43_v12 = vpop.xlane.xlu0 %42 }
  0xaa   :  { %v55_v14 = vrot.slane %v43_v12, %v50_v11 }
  0xac   :  { %v57_v15 = vsel %vm56_vm1, %v55_v14, %v51_v13 }
  0xad   :  { %v60_v16 = vsel %vm59_vm2, %v57_v15, -inf }
  0xae   :  { %61 = vmax.xlane.f32.xlu1 %v60_v16 }
 0x13b   :  { %v62_v20 = vpop.xlane.xlu1 %61 }
 0x13c   :  { %v67_v21 = vrot.slane %v62_v20, %v66_v18  ;;  %v71_v22 = vrot.slane %v62_v20, %v70_v19 }
 0x13e   :  { %v74_v23 = vsub.f32 %v40_v10, %v67_v21  ;;  %v75_v24 = vsub.f32 %v43_v12, %v71_v22 }
 0x140   :  { %v76_v25 = vmul.f32 1.442695, %v74_v23  ;;  %v78_v26 = vmul.f32 1.442695, %v75_v24 }
 0x142   :  { %327 = vpow2.f32 %v76_v25 }
 0x143   :  { %329 = vpow2.f32 %v78_v26 }
 0x14c   :  { %v328_v27 = vpop.eup %327 }
 0x14d   :  { %v330_v28 = vpop.eup %329  ;;  %83 = vperm.xlu1 %325, %v328_v27  }
 0x14e   :  { %86 = vperm.xlu0 %326, %v330_v28  }
 0x1cc   :  { %v84_v29 = vpop.permute.xlu1 %83 }
 0x1cd   :  { %v87_v30 = vpop.permute.xlu0 %86  ;;  %v91_v31 = vrot.slane %v84_v29, %v50_v11 }
 0x1ce   :  { %v95_v32 = vrot.slane %v87_v30, %v50_v11 }
 0x1d0   :  { %v96_v33 = vsel %vm56_vm1, %v95_v32, %v91_v31 }
 0x1d1   :  { %v98_v34 = vsel %vm59_vm2, %v96_v33, 0.0 }
 0x1d2   :  { %99 = vadd.xlane.f32.xlu1 %v98_v34 }
 0x25f   :  { %v100_v35 = vpop.xlane.xlu1 %99 }
 0x260   :  { %331 = vrcp.f32 %v100_v35 }
 0x26a   :  { %v332_v36 = vpop.eup %331 }
 0x26b   :  { %v102_v37 = vmul.f32 %v332_v36, %v100_v35 }
 0x26d   :  { %v103_v38 = vsub.f32 2.0, %v102_v37 }
 0x26f   :  { %v104_v39 = vmul.f32 %v332_v36, %v103_v38 }
 0x271   :  { %v113_v40 = vrot.slane %v104_v39, %v70_v19  ;;  %v109_v41 = vrot.slane %v104_v39, %v66_v18 }
 0x273   :  { %v117_v42 = vmul.f32 %v330_v28, %v113_v40  ;;  %v116_v44 = vmul.f32 %v328_v27, %v109_v41 }
 0x275   :  { %201 = vperm.xlu0 %326, %v117_v42  }
 0x279   :  { %120 = vperm.xlu0 %326, %v116_v44  }
 0x2f4   :  { %v202_v45 = vpop.permute.xlu0 %201 }
 0x2f5   :  { %v206_v46 = vrot.slane %v202_v45, %v50_v11 }
 0x2f7   :  { %316 = vmatmul.mubr.msk.f32.vlgmr.msra.gmra.mrb[0].mxu1 %vm126_vm4, %v206_v46 }
 0x2f8   :  { %v121_v47 = vpop.permute.xlu0 %120 }
 0x2f9   :  { %v125_v48 = vrot.slane %v121_v47, %v50_v11 }
 0x2fb   :  { %311 = vmatmul.mubr.msk.f32.vlgmr.msra.gmra.mrb[0].mxu0 %vm126_vm4, %v125_v48 }
 0x3ca   :  { %v275_v49 = vpop.f32.mrb[0].mxu1 }
 0x3cb   :  { %v317_v50 = vpop.f32.mrb[1].mxu1  ;;  %v281_v51 = vrot.slane %v275_v49, 7 }
 0x3ce   :  { %v195_v52 = vpop.f32.mrb[0].mxu0 }
 0x3cf   :  { %v282_v53 = vsel %vm56_vm1, %v281_v51, %v195_v52  ;;  %v312_v54 = vpop.f32.mrb[1].mxu0 }
 0x3d0   :  { %285 = vst.msk [vmem:[#allocation5] sm:$0x3] %vm284_vm5, %v282_v53 }
 0x3d1   :  { %366 = shalt.err (!%p363_p12)
}
 0x3d2   :  { %s367_s28 = scalar_lea.hbm %s441_s2, 32 }
 0x3d3   :  { %p368_p13 = scmp.ne.s32.totalorder %s441_s2, %s367_s28  ;;  %p371_p0 = scmp.lt.u32.totalorder %s367_s28, %s441_s2 }
 0x3d5   :  { %p373_p1 = pnand %p371_p0, %p368_p13 }
 0x3d7   :  { %376 = shalt.err (!%p373_p1)
}
 0x3d8   :  { %295 = dma.vmem_to_hbm [thread:$0]  %s293_s1, 32, %s441_s2, [#allocation4]  }
 0x3d9   :  { %379 = dma.done.wait [#allocation4], 32  }
 0x3da   :  { %380 = vsyncadd [#allocation4], 4294967264 }
 0x3db   :  { %299 = vsyncpa [#allocation3], 1 }
 0x3dc   :  { %300 = vsyncpa [#allocation4], 1 }

</bundles_post_ra>
